<compile_context>
chip_gen: v6e
topology: v6e:2x2x1
jax: 0.10.0
libtpu: 0.0.40
codegen_flags: <defaults>
</compile_context>

<pallas_src>
import jax
import jax.numpy as jnp
from jax.experimental import pallas as pl
from jax.experimental.pallas import tpu as pltpu


def _msa_kernel(x_ref, w_ref, b_ref, o_ref):
    # x_ref: (C*K, Nt)  -- row index = c*K + k; Nt lane-dense fused B*L columns
    # w_ref: (K, K)     -- PyTorch nn.Linear weight, (out, in) orientation
    # b_ref: (K, 1)     -- bias as a column (broadcasts over lanes)
    # o_ref: (C, Nt)    -- lane-dense output slab
    C = o_ref.shape[0]
    CK = x_ref.shape[0]
    K = CK // C

    xf = x_ref[...].astype(jnp.float32)          # load + convert ONCE, reuse below
    wf = w_ref[...].astype(jnp.float32)
    bf = b_ref[...].astype(jnp.float32)

    # s[k, n] = sum_c x[c*K + k, n]  -- static sublane-slice adds (pure VPU)
    s = xf[0:K, :]
    for c in range(1, C):
        s = s + xf[c * K:(c + 1) * K, :]         # (K, Nt)

    # logits[o, n] = sum_k w[o, k] * s[k, n] + b[o]
    # K == 6 -> unrolled broadcast FMAs on the VPU; avoids a near-empty 6x6
    # MXU matmul whose vmatmul push would share the vector-extended slot with
    # the XLU reduces below (the v7x bottleneck after the DMA fixes).
    logits = wf[:, 0:1] * s[0:1, :]              # (K,1)*(1,Nt) -> (K, Nt)
    for k in range(1, K):
        logits = logits + wf[:, k:k + 1] * s[k:k + 1, :]
    logits = logits + bf                         # (K, Nt)

    # softmax over K (sublane axis): cheap 6-row cross-sublane max/sum.
    m = jnp.max(logits, axis=0, keepdims=True)   # (1, Nt)
    e = jnp.exp(logits - m)                      # (K, Nt)
    # exact reciprocal keeps the 1e-5 match with the PyTorch reference
    a = e * pl.reciprocal(jnp.sum(e, axis=0, keepdims=True), approx=False)

    # out[c, n] = sum_k a[k, n] * x[c*K + k, n]  -- one 6-row sublane reduce
    # per channel (4 total).
    rows = [jnp.sum(xf[c * K:(c + 1) * K, :] * a, axis=0, keepdims=True)
            for c in range(C)]
    o_ref[...] = jnp.concatenate(rows, axis=0).astype(o_ref.dtype)


def multi_scale_attention(x, w, b, *, n_tile_target=32768):
    """x: (B, C, L, K); w: (K, K) (PyTorch Linear weight); b: (K,). Returns (B, L, C).

    n_tile_target: lane-tile size target (rounded to a multiple of 128).  32768
    amortizes per-step overhead on v6e/v7x; 16384 is a reasonable choice on v5e.
    """
    B, C, L, K = x.shape
    N = B * L

    # Re-layout: tiny (C, K) flattened onto 24 sublane rows, big fused B*L on
    # lanes.  XLA handles this transpose outside the kernel (ideally fused
    # with x's producer -- see module docstring).
    xt = jnp.transpose(x, (1, 3, 0, 2)).reshape(C * K, N)       # (C*K, B*L)

    lane_target = max(128, (n_tile_target // 128) * 128)        # enforce 128-multiple
    if N <= 1024:
        # Tiny problem: a single full-extent block (no 128 constraint applies).
        Nt, Np = N, N
    else:
        # >= 2 grid steps so v7x can shard the "parallel" axis across both TCs,
        # each tile a multiple of 128 lanes, capped by the VMEM-sized target.
        half = pl.cdiv(N, 256) * 128                            # ~N/2, 128-aligned
        Nt = min(lane_target, half)
        Np = pl.cdiv(N, Nt) * Nt
        if Np != N:
            # Zero-padded columns are harmless (softmax of bias only, weighted
            # sum of zeros) and are sliced off below.
            xt = jnp.pad(xt, ((0, 0), (0, Np - N)))

    b2d = b.reshape(K, 1)

    out = pl.pallas_call(
        _msa_kernel,
        out_shape=jax.ShapeDtypeStruct((C, Np), x.dtype),
        grid_spec=pltpu.PrefetchScalarGridSpec(
            num_scalar_prefetch=0,
            grid=(Np // Nt,),
            in_specs=[
                pl.BlockSpec((C * K, Nt), lambda i: (0, i)),
                pl.BlockSpec((K, K), lambda i: (0, 0)),
                pl.BlockSpec((K, 1), lambda i: (0, 0)),
            ],
            out_specs=pl.BlockSpec((C, Nt), lambda i: (0, i)),
        ),
        compiler_params=pltpu.CompilerParams(
            dimension_semantics=("parallel",),
            # Raise the scoped-VMEM ceiling (v5e default is 16 MiB) while
            # staying within v7x's 64 MiB physical per-TC VMEM.  Actual usage
            # at Nt=32768 is ~20 MiB (blocks + f32 temporaries).
            vmem_limit_bytes=64 << 20,
        ),
    )(xt, w, b2d)

    # (C, B*L) -> (B, L, C)  (cheap XLA transpose outside the kernel)
    return jnp.transpose(out[:, :N].reshape(C, B, L), (1, 2, 0))


def _reference(x, w, b):
    s = jnp.sum(x, axis=1)                              # (B, L, K)
    logits = jnp.einsum("blk,ok->blo", s, w) + b        # (B, L, K)
    a = jax.nn.softmax(logits, axis=-1)[:, None, :, :]  # (B, 1, L, K)
    return jnp.sum(a * x, axis=-1).transpose(0, 2, 1)   # (B, L, C)


if __name__ == "__main__":
    B, C, L, K = 2, 4, 16, 6

    key = jax.random.PRNGKey(0)
    kx, kw, kb = jax.random.split(key, 3)

    x = jax.random.normal(kx, (B, C, L, K), dtype=jnp.float32)
    # nn.Linear(K, K) default-ish init: uniform(-1/sqrt(K), 1/sqrt(K)), deterministic.
    bound = 1.0 / (K ** 0.5)
    w = jax.random.uniform(kw, (K, K), dtype=jnp.float32, minval=-bound, maxval=bound)
    b = jax.random.uniform(kb, (K,), dtype=jnp.float32, minval=-bound, maxval=bound)

    out = jax.block_until_ready(multi_scale_attention(x, w, b))
    ref = _reference(x, w, b)

    assert out.shape == (B, L, C), out.shape
    assert jnp.allclose(out, ref, atol=1e-5, rtol=1e-5), float(jnp.max(jnp.abs(out - ref)))
    print("KERNEL_OK")
</pallas_src>

<mosaic_0001>
module attributes {stable_mosaic.version = 11 : i64} {
  func.func @_msa_kernel(%arg0: i32, %arg1: memref<24x32xf32, #tpu.memory_space<vmem>>, %arg2: memref<6x6xf32, #tpu.memory_space<vmem>>, %arg3: memref<6x1xf32, #tpu.memory_space<vmem>>, %arg4: memref<4x32xf32, #tpu.memory_space<vmem>>) attributes {dimension_semantics = [#tpu.dimension_semantics<parallel>], iteration_bounds = array<i64: 1>, scalar_prefetch = 0 : i64, scratch_operands = 0 : i64, tpu.core_type = #tpu.core_type<tc>, window_params = [{transform_indices = @transform_0, window_bounds = array<i64: 24, 32>}, {pipeline_mode = #tpu.pipeline_mode<synchronous>, transform_indices = @transform_1, window_bounds = array<i64: 6, 6>}, {pipeline_mode = #tpu.pipeline_mode<synchronous>, transform_indices = @transform_2, window_bounds = array<i64: 6, 1>}, {transform_indices = @transform_3, window_bounds = array<i64: 4, 32>}]} {
    %c0 = arith.constant 0 : index
    %c0_0 = arith.constant 0 : index
    %0 = vector.load %arg1[%c0, %c0_0] : memref<24x32xf32, #tpu.memory_space<vmem>>, vector<24x32xf32>
    %c0_1 = arith.constant 0 : index
    %c0_2 = arith.constant 0 : index
    %1 = vector.load %arg2[%c0_1, %c0_2] : memref<6x6xf32, #tpu.memory_space<vmem>>, vector<6x6xf32>
    %c0_3 = arith.constant 0 : index
    %c0_4 = arith.constant 0 : index
    %2 = vector.load %arg3[%c0_3, %c0_4] : memref<6x1xf32, #tpu.memory_space<vmem>>, vector<6x1xf32>
    %3 = vector.extract_strided_slice %0 {offsets = [0, 0], sizes = [6, 32], strides = [1, 1]} : vector<24x32xf32> to vector<6x32xf32>
    %4 = vector.extract_strided_slice %0 {offsets = [6, 0], sizes = [6, 32], strides = [1, 1]} : vector<24x32xf32> to vector<6x32xf32>
    %5 = arith.addf %3, %4 : vector<6x32xf32>
    %6 = vector.extract_strided_slice %0 {offsets = [12, 0], sizes = [6, 32], strides = [1, 1]} : vector<24x32xf32> to vector<6x32xf32>
    %7 = arith.addf %5, %6 : vector<6x32xf32>
    %8 = vector.extract_strided_slice %0 {offsets = [18, 0], sizes = [6, 32], strides = [1, 1]} : vector<24x32xf32> to vector<6x32xf32>
    %9 = arith.addf %7, %8 : vector<6x32xf32>
    %10 = vector.extract_strided_slice %1 {offsets = [0, 0], sizes = [6, 1], strides = [1, 1]} : vector<6x6xf32> to vector<6x1xf32>
    %11 = vector.extract_strided_slice %9 {offsets = [0, 0], sizes = [1, 32], strides = [1, 1]} : vector<6x32xf32> to vector<1x32xf32>
    %12 = vector.broadcast %10 : vector<6x1xf32> to vector<6x32xf32>
    %13 = vector.broadcast %11 : vector<1x32xf32> to vector<6x32xf32>
    %14 = arith.mulf %12, %13 : vector<6x32xf32>
    %15 = vector.extract_strided_slice %1 {offsets = [0, 1], sizes = [6, 1], strides = [1, 1]} : vector<6x6xf32> to vector<6x1xf32>
    %16 = vector.extract_strided_slice %9 {offsets = [1, 0], sizes = [1, 32], strides = [1, 1]} : vector<6x32xf32> to vector<1x32xf32>
    %17 = vector.broadcast %15 : vector<6x1xf32> to vector<6x32xf32>
    %18 = vector.broadcast %16 : vector<1x32xf32> to vector<6x32xf32>
    %19 = arith.mulf %17, %18 : vector<6x32xf32>
    %20 = arith.addf %14, %19 : vector<6x32xf32>
    %21 = vector.extract_strided_slice %1 {offsets = [0, 2], sizes = [6, 1], strides = [1, 1]} : vector<6x6xf32> to vector<6x1xf32>
    %22 = vector.extract_strided_slice %9 {offsets = [2, 0], sizes = [1, 32], strides = [1, 1]} : vector<6x32xf32> to vector<1x32xf32>
    %23 = vector.broadcast %21 : vector<6x1xf32> to vector<6x32xf32>
    %24 = vector.broadcast %22 : vector<1x32xf32> to vector<6x32xf32>
    %25 = arith.mulf %23, %24 : vector<6x32xf32>
    %26 = arith.addf %20, %25 : vector<6x32xf32>
    %27 = vector.extract_strided_slice %1 {offsets = [0, 3], sizes = [6, 1], strides = [1, 1]} : vector<6x6xf32> to vector<6x1xf32>
    %28 = vector.extract_strided_slice %9 {offsets = [3, 0], sizes = [1, 32], strides = [1, 1]} : vector<6x32xf32> to vector<1x32xf32>
    %29 = vector.broadcast %27 : vector<6x1xf32> to vector<6x32xf32>
    %30 = vector.broadcast %28 : vector<1x32xf32> to vector<6x32xf32>
    %31 = arith.mulf %29, %30 : vector<6x32xf32>
    %32 = arith.addf %26, %31 : vector<6x32xf32>
    %33 = vector.extract_strided_slice %1 {offsets = [0, 4], sizes = [6, 1], strides = [1, 1]} : vector<6x6xf32> to vector<6x1xf32>
    %34 = vector.extract_strided_slice %9 {offsets = [4, 0], sizes = [1, 32], strides = [1, 1]} : vector<6x32xf32> to vector<1x32xf32>
    %35 = vector.broadcast %33 : vector<6x1xf32> to vector<6x32xf32>
    %36 = vector.broadcast %34 : vector<1x32xf32> to vector<6x32xf32>
    %37 = arith.mulf %35, %36 : vector<6x32xf32>
    %38 = arith.addf %32, %37 : vector<6x32xf32>
    %39 = vector.extract_strided_slice %1 {offsets = [0, 5], sizes = [6, 1], strides = [1, 1]} : vector<6x6xf32> to vector<6x1xf32>
    %40 = vector.extract_strided_slice %9 {offsets = [5, 0], sizes = [1, 32], strides = [1, 1]} : vector<6x32xf32> to vector<1x32xf32>
    %41 = vector.broadcast %39 : vector<6x1xf32> to vector<6x32xf32>
    %42 = vector.broadcast %40 : vector<1x32xf32> to vector<6x32xf32>
    %43 = arith.mulf %41, %42 : vector<6x32xf32>
    %44 = arith.addf %38, %43 : vector<6x32xf32>
    %45 = vector.broadcast %2 : vector<6x1xf32> to vector<6x32xf32>
    %46 = arith.addf %44, %45 : vector<6x32xf32>
    %cst = arith.constant dense<0xFF800000> : vector<32xf32>
    %47 = vector.multi_reduction <maximumf>, %46, %cst [0] : vector<6x32xf32> to vector<32xf32>
    %48 = vector.shape_cast %47 : vector<32xf32> to vector<1x32xf32>
    %49 = vector.broadcast %48 : vector<1x32xf32> to vector<6x32xf32>
    %50 = arith.subf %46, %49 : vector<6x32xf32>
    %51 = math.exp %50 : vector<6x32xf32>
    %cst_5 = arith.constant dense<0.000000e+00> : vector<32xf32>
    %52 = vector.multi_reduction <add>, %51, %cst_5 [0] : vector<6x32xf32> to vector<32xf32>
    %53 = vector.shape_cast %52 : vector<32xf32> to vector<1x32xf32>
    %54 = tpu.reciprocal %53 : vector<1x32xf32> -> vector<1x32xf32>
    %55 = vector.broadcast %54 : vector<1x32xf32> to vector<6x32xf32>
    %56 = arith.mulf %51, %55 : vector<6x32xf32>
    %57 = vector.extract_strided_slice %0 {offsets = [0, 0], sizes = [6, 32], strides = [1, 1]} : vector<24x32xf32> to vector<6x32xf32>
    %58 = arith.mulf %57, %56 : vector<6x32xf32>
    %cst_6 = arith.constant dense<0.000000e+00> : vector<32xf32>
    %59 = vector.multi_reduction <add>, %58, %cst_6 [0] : vector<6x32xf32> to vector<32xf32>
    %60 = vector.shape_cast %59 : vector<32xf32> to vector<1x32xf32>
    %61 = vector.extract_strided_slice %0 {offsets = [6, 0], sizes = [6, 32], strides = [1, 1]} : vector<24x32xf32> to vector<6x32xf32>
    %62 = arith.mulf %61, %56 : vector<6x32xf32>
    %cst_7 = arith.constant dense<0.000000e+00> : vector<32xf32>
    %63 = vector.multi_reduction <add>, %62, %cst_7 [0] : vector<6x32xf32> to vector<32xf32>
    %64 = vector.shape_cast %63 : vector<32xf32> to vector<1x32xf32>
    %65 = vector.extract_strided_slice %0 {offsets = [12, 0], sizes = [6, 32], strides = [1, 1]} : vector<24x32xf32> to vector<6x32xf32>
    %66 = arith.mulf %65, %56 : vector<6x32xf32>
    %cst_8 = arith.constant dense<0.000000e+00> : vector<32xf32>
    %67 = vector.multi_reduction <add>, %66, %cst_8 [0] : vector<6x32xf32> to vector<32xf32>
    %68 = vector.shape_cast %67 : vector<32xf32> to vector<1x32xf32>
    %69 = vector.extract_strided_slice %0 {offsets = [18, 0], sizes = [6, 32], strides = [1, 1]} : vector<24x32xf32> to vector<6x32xf32>
    %70 = arith.mulf %69, %56 : vector<6x32xf32>
    %cst_9 = arith.constant dense<0.000000e+00> : vector<32xf32>
    %71 = vector.multi_reduction <add>, %70, %cst_9 [0] : vector<6x32xf32> to vector<32xf32>
    %72 = vector.shape_cast %71 : vector<32xf32> to vector<1x32xf32>
    %73 = tpu.concatenate %60, %64, %68, %72 in 0 : vector<1x32xf32>, vector<1x32xf32>, vector<1x32xf32>, vector<1x32xf32> -> vector<4x32xf32>
    %c0_10 = arith.constant 0 : index
    %c0_11 = arith.constant 0 : index
    %74 = vector.load %arg4[%c0_10, %c0_11] : memref<4x32xf32, #tpu.memory_space<vmem>>, vector<4x32xf32>
    tpu.vector_store %arg4[%c0_10, %c0_11], %73 {strides = array<i32>} : memref<4x32xf32, #tpu.memory_space<vmem>>, vector<4x32xf32>,
    return
  }
  func.func @transform_0(%arg0: i32) -> (i32, i32) {
    %c0_i32 = arith.constant 0 : i32
    %c0_i32_0 = arith.constant 0 : i32
    return %c0_i32, %arg0 : i32, i32
  }
  func.func @transform_1(%arg0: i32) -> (i32, i32) {
    %c0_i32 = arith.constant 0 : i32
    %c0_i32_0 = arith.constant 0 : i32
    %c0_i32_1 = arith.constant 0 : i32
    return %c0_i32, %c0_i32_0 : i32, i32
  }
  func.func @transform_2(%arg0: i32) -> (i32, i32) {
    %c0_i32 = arith.constant 0 : i32
    %c0_i32_0 = arith.constant 0 : i32
    %c0_i32_1 = arith.constant 0 : i32
    return %c0_i32, %c0_i32_0 : i32, i32
  }
  func.func @transform_3(%arg0: i32) -> (i32, i32) {
    %c0_i32 = arith.constant 0 : i32
    %c0_i32_0 = arith.constant 0 : i32
    return %c0_i32, %arg0 : i32, i32
  }
}

</mosaic_0001>

<bundles_post_ra>
// kernel: tpu_custom_call.1
= control target key start
LH: loop header
LB: loop body
LE: loop exit
PB: predicated region body
PF: predicated region fallthrough
CT: control target
= control target key end

     0   :  { %8 = vsyncpa [#allocation3], 0  ;;  %s353_s0 = inlined_call_operand.hbm [shape: f32[24,32], index: 0, kind: input, shape index: {}]   ;;  %s354_s1 = inlined_call_operand.vmem [shape: f32[6,6], index: 1, kind: input, shape index: {}]   ;;  %s355_s2 = inlined_call_operand.vmem [shape: f32[6,1], index: 2, kind: input, shape index: {}]   ;;  %s356_s3 = inlined_call_operand.hbm [shape: f32[4,32], index: 3, kind: output, shape index: {}]  }
   0x1   :  { %9 = vsyncpa [#allocation4], 0  ;;  %s282_s12 = smov [#allocation2]  }
   0x2   :  { %s15_s13 = sshll.u32 %s282_s12, 4  ;;  %s16_s13 = int_to_ptr.vmem [resolvable:$true] %s15_s13 }
   0x3   :  { %s246_s14 = scalar_lea.vmem %s16_s13, 384  ;;  %p251_p1 = scmp.lt.s32.totalorder %s16_s13, %s16_s13 }
   0x4   :  { %p247_p0 = scmp.ne.s32.totalorder %s16_s13, %s246_s14  ;;  %p252_p2 = scmp.lt.s32.totalorder %s246_s14, %s246_s14 }
   0x6   :  { %p253_p3 = por %p252_p2, %p251_p1 }
   0x8   :  { %p254_p4 = pnand %p253_p3, %p247_p0 }
   0xa   :  { %257 = shalt.err (!%p254_p4)
}
   0xb   :  { %s283_s15 = smov 128   ;;  %s284_s16 = smov 8  }
   0xc   :  { %21 = dma.hbm_to_vmem [thread:$0]  %s353_s0, 384, %s16_s13, [#allocation3], %s283_s15, %s283_s15, %s284_s16  }
   0xd   :  { %278 = dma.done.wait [#allocation3], 384  }
   0xe   :  { %279 = vsyncadd [#allocation3], 4294966912  ;;  %v285_v0 = vmov 0   ;;  %v286_v1 = vmov 2   ;;  %v32_v2 = vld [vmem:[%s354_s1] sm:$0x3f]  ;;  %v57_v16 = vlaneseq }
   0xf   :  { %226 = vset.pattern.permute.xlu0 %v285_v0  ;;  %228 = vset.pattern.permute.xlu1 %v286_v1  ;;  %v287_v3 = vmov 1   ;;  %v288_v4 = vmov 3   ;;  %v289_v5 = vmov 4   ;;  %v290_v6 = vmov 5   ;;  %v33_v7 = vld [vmem:[%s355_s2] sm:$0x3f] }
  0x10   :  { %54 = vperm.xlu0 %226, %v32_v2   ;;  %73 = vperm.xlu1 %228, %v32_v2   ;;  %v321_v8 = vld [vmem:[#allocation2] sm:$0xff]  ;;  %v323_v9 = vld [vmem:[#allocation2 + $0x8] sm:$0xff]  ;;  %vm36_vm0 = vcmask 1041408   ;;  %v327_v12 = vld [vmem:[#allocation2 + $0x10] sm:$0xff]  ;;  %vm43_vm1 = vcmask 1043456   ;;  %v58_v19 = vshrl.u32 %v57_v16, 7 }
  0x11   :  { %v37_v10 = vrot.slane %v321_v8, 6  ;;  %v38_v11 = vrot.slane %v323_v9, 6  ;;  %v44_v14 = vrot.slane %v323_v9, 4  ;;  %v45_v15 = vrot.slane %v327_v12, 4  ;;  %s291_s1 = smov [#allocation5]  }
  0x12   :  { %v49_v21 = vrot.slane %v327_v12, 2  ;;  %v59_v22 = vsub.s32 0, %v58_v19  ;;  %v68_v24 = vsub.s32 1, %v58_v19  ;;  %v78_v26 = vsub.s32 2, %v58_v19  ;;  %s207_s2 = sshll.u32 %s291_s1, 4  ;;  %s208_s2 = int_to_ptr.vmem [resolvable:$true] %s207_s2 }
  0x13   :  { %v39_v13 = vsel %vm36_vm0, %v37_v10, %v38_v11  ;;  %v46_v18 = vsel %vm43_vm1, %v44_v14, %v45_v15  ;;  %v88_v30 = vsub.s32 3, %v58_v19  ;;  %v98_v31 = vsub.s32 4, %v58_v19  ;;  %s258_s22 = scalar_lea.vmem %s208_s2, 64  ;;  %p263_p6 = scmp.lt.s32.totalorder %s208_s2, %s208_s2 }
  0x14   :  { %227 = vset.pattern.permute.xlu0 %v287_v3  ;;  %229 = vset.pattern.permute.xlu1 %v288_v4  ;;  %v41_v17 = vadd.f32 %v39_v13, %v321_v8  ;;  %v108_v33 = vsub.s32 5, %v58_v19  ;;  %vm118_vm2 = vcmask 259072   ;;  %vm194_vm3 = vcmask 1040384   ;;  %p259_p5 = scmp.ne.s32.totalorder %s208_s2, %s258_s22  ;;  %p264_p7 = scmp.lt.s32.totalorder %s258_s22, %s258_s22 }
  0x15   :  { %63 = vperm.xlu0 %227, %v32_v2   ;;  %83 = vperm.xlu1 %229, %v32_v2   ;;  %vm197_vm4 = vcmask 1042432   ;;  %vm199_vm5 = vcmask 257024  }
  0x16   :  { %v48_v20 = vadd.f32 %v46_v18, %v41_v17  ;;  %p265_p8 = por %p264_p7, %p263_p6 }
  0x18   :  { %v51_v23 = vadd.f32 %v49_v21, %v48_v20  ;;  %p266_p9 = pnand %p265_p8, %p259_p5 }
  0x19   :  { %230 = vset.pattern.permute.xlu1 %v289_v5  ;;  %231 = vset.pattern.permute.xlu0 %v290_v6 }
  0x1a   :  { %93 = vperm.xlu1 %230, %v32_v2   ;;  %103 = vperm.xlu0 %231, %v32_v2   ;;  %v60_v28 = vrot.slane %v51_v23, %v59_v22  ;;  %v69_v29 = vrot.slane %v51_v23, %v68_v24  ;;  %v79_v32 = vrot.slane %v51_v23, %v78_v26 }
  0x1b   :  { %v89_v38 = vrot.slane %v51_v23, %v88_v30  ;;  %v99_v39 = vrot.slane %v51_v23, %v98_v31  ;;  %v109_v42 = vrot.slane %v51_v23, %v108_v33 }
  0x1e   :  { %232 = vset.pattern.permute.xlu1 %v285_v0  ;;  %233 = vset.pattern.permute.xlu0 %v285_v0 }
  0x1f   :  { %114 = vperm.xlu1 %232, %v33_v7  }
  0x8b   :  { %v55_v25 = vpop.permute.xlu0 %54  ;;  %v74_v27 = vpop.permute.xlu1 %73 }
  0x8c   :  { %v61_v36 = vmul.f32 %v60_v28, %v55_v25  ;;  %v80_v40 = vmul.f32 %v79_v32, %v74_v27 }
  0x90   :  { %v64_v34 = vpop.permute.xlu0 %63  ;;  %v84_v35 = vpop.permute.xlu1 %83 }
  0x91   :  { %v70_v37 = vmul.f32 %v69_v29, %v64_v34  ;;  %v90_v44 = vmul.f32 %v89_v38, %v84_v35 }
  0x93   :  { %v71_v41 = vadd.f32 %v70_v37, %v61_v36 }
  0x95   :  { %v81_v43 = vadd.f32 %v80_v40, %v71_v41  ;;  %v94_v45 = vpop.permute.xlu1 %93  ;;  %v104_v46 = vpop.permute.xlu0 %103 }
  0x96   :  { %v100_v47 = vmul.f32 %v99_v39, %v94_v45  ;;  %v110_v49 = vmul.f32 %v109_v42, %v104_v46 }
  0x97   :  { %v91_v48 = vadd.f32 %v90_v44, %v81_v43 }
  0x99   :  { %v101_v50 = vadd.f32 %v100_v47, %v91_v48 }
  0x9a   :  { %v115_v51 = vpop.permute.xlu1 %114 }
  0x9b   :  { %v111_v52 = vadd.f32 %v110_v49, %v101_v50 }
  0x9d   :  { %v117_v53 = vadd.f32 %v115_v51, %v111_v52 }
  0x9f   :  { %v119_v54 = vsel %vm118_vm2, %v117_v53, -inf }
  0xa0   :  { %v120_v55 = vrot.slane %v119_v54, 4 }
  0xa2   :  { %v121_v56 = vmax.f32 %v119_v54, %v120_v55 }
  0xa4   :  { %v122_v57 = vrot.slane %v121_v56, 2 }
  0xa6   :  { %v123_v58 = vmax.f32 %v121_v56, %v122_v57 }
  0xa8   :  { %v124_v59 = vrot.slane %v123_v58, 1 }
  0xaa   :  { %v125_v60 = vmax.f32 %v123_v58, %v124_v59 }
  0xac   :  { %v126_v61 = vsub.f32 %v117_v53, %v125_v60 }
  0xae   :  { %v127_v62 = vmul.f32 1.442695, %v126_v61 }
  0xb0   :  { %234 = vpow2.f32 %v127_v62 }
  0xbd   :  { %v235_v63 = vpop.eup %234 }
  0xbe   :  { %v129_v0 = vsel %vm118_vm2, %v235_v63, 0.0 }
  0xbf   :  { %v130_v1 = vrot.slane %v129_v0, 4 }
  0xc1   :  { %v131_v2 = vadd.f32 %v130_v1, %v129_v0 }
  0xc3   :  { %v132_v3 = vrot.slane %v131_v2, 2 }
  0xc5   :  { %v133_v4 = vadd.f32 %v132_v3, %v131_v2 }
  0xc7   :  { %v134_v5 = vrot.slane %v133_v4, 1 }
  0xc9   :  { %v135_v6 = vadd.f32 %v134_v5, %v133_v4 }
  0xcb   :  { %236 = vrcp.f32 %v135_v6 }
  0xd8   :  { %v237_v7 = vpop.eup %236 }
  0xd9   :  { %v137_v10 = vmul.f32 %v237_v7, %v235_v63 }
  0xdb   :  { %v147_v11 = vrot.slane %v137_v10, 2  ;;  %v138_v13 = vmul.f32 %v137_v10, %v321_v8  ;;  %v164_v14 = vrot.slane %v137_v10, 4  ;;  %v181_v15 = vrot.slane %v137_v10, 6 }
  0xdd   :  { %v139_v16 = vsel %vm118_vm2, %v138_v13, 0.0  ;;  %v149_v17 = vmul.f32 %v147_v11, %v321_v8  ;;  %v150_v18 = vmul.f32 %v147_v11, %v323_v9  ;;  %v166_v19 = vmul.f32 %v164_v14, %v323_v9 }
  0xde   :  { %v140_v20 = vrot.slane %v139_v16, 4  ;;  %v167_v21 = vmul.f32 %v164_v14, %v327_v12  ;;  %v183_v22 = vmul.f32 %v181_v15, %v327_v12 }
  0xdf   :  { %v153_v23 = vrot.slane %v149_v17, 6  ;;  %v154_v24 = vrot.slane %v150_v18, 6  ;;  %v170_v25 = vrot.slane %v166_v19, 4 }
  0xe0   :  { %v141_v26 = vadd.f32 %v140_v20, %v139_v16  ;;  %v171_v27 = vrot.slane %v167_v21, 4  ;;  %v185_v28 = vrot.slane %v183_v22, 2 }
  0xe1   :  { %v155_v29 = vsel %vm36_vm0, %v153_v23, %v154_v24 }
  0xe2   :  { %v142_v30 = vrot.slane %v141_v26, 2  ;;  %v157_v8 = vsel %vm118_vm2, %v155_v29, 0.0  ;;  %v172_v31 = vsel %vm43_vm1, %v170_v25, %v171_v27  ;;  %v187_v9 = vsel %vm118_vm2, %v185_v28, 0.0 }
  0xe3   :  { %v158_v32 = vrot.slane %v157_v8, 4  ;;  %v174_v33 = vsel %vm118_vm2, %v172_v31, 0.0  ;;  %v188_v34 = vrot.slane %v187_v9, 4 }
  0xe4   :  { %v175_v12 = vrot.slane %v174_v33, 4  ;;  %v143_v35 = vadd.f32 %v142_v30, %v141_v26 }
  0xe5   :  { %v159_v36 = vadd.f32 %v158_v32, %v157_v8  ;;  %v189_v37 = vadd.f32 %v188_v34, %v187_v9 }
  0xe6   :  { %v176_v38 = vadd.f32 %v175_v12, %v174_v33  ;;  %v144_v42 = vrot.slane %v143_v35, 1 }
  0xe7   :  { %v160_v39 = vrot.slane %v159_v36, 2  ;;  %v190_v40 = vrot.slane %v189_v37, 2 }
  0xe8   :  { %v177_v41 = vrot.slane %v176_v38, 2  ;;  %v145_v49 = vadd.f32 %v144_v42, %v143_v35 }
  0xe9   :  { %v161_v43 = vadd.f32 %v160_v39, %v159_v36  ;;  %v191_v44 = vadd.f32 %v190_v40, %v189_v37 }
  0xea   :  { %v178_v45 = vadd.f32 %v177_v41, %v176_v38 }
  0xeb   :  { %v162_v46 = vrot.slane %v161_v43, 1  ;;  %v192_v47 = vrot.slane %v191_v44, 1 }
  0xec   :  { %v179_v48 = vrot.slane %v178_v45, 1 }
  0xed   :  { %v163_v50 = vadd.f32 %v162_v46, %v161_v43  ;;  %v193_v52 = vadd.f32 %v192_v47, %v191_v44 }
  0xee   :  { %v180_v51 = vadd.f32 %v179_v48, %v178_v45 }
  0xef   :  { %v195_v53 = vsel %vm194_vm3, %v145_v49, %v163_v50 }
  0xf0   :  { %v196_v54 = vsel %vm36_vm0, %v195_v53, %v180_v51 }
  0xf1   :  { %v198_v55 = vsel %vm197_vm4, %v196_v54, %v193_v52 }
  0xf2   :  { %200 = vst.msk [vmem:[#allocation5] sm:$0xf] %vm199_vm5, %v198_v55 }
  0xf3   :  { %269 = shalt.err (!%p266_p9)
}
  0xf4   :  { %210 = dma.vmem_to_hbm [thread:$0]  %s208_s2, 64, %s356_s3, [#allocation4]  }
  0xf5   :  { %280 = dma.done.wait [#allocation4], 64  }
  0xf6   :  { %281 = vsyncadd [#allocation4], 4294967232 }
  0xf7   :  { %214 = vsyncpa [#allocation3], 1 }
  0xf8   :  { %215 = vsyncpa [#allocation4], 1 }

</bundles_post_ra>
